<compile_context>
chip_gen: v5e
topology: v5e:2x2
jax: 0.10.0
libtpu: 0.0.40
codegen_flags: <defaults>
</compile_context>

<pallas_src>
import functools

import jax
import jax.numpy as jnp
from jax.experimental import pallas as pl
from jax.experimental.pallas import tpu as pltpu

_LANE = 128
_MIN_GRID_STEPS = 8                    # >= 4 blocks per v7x TensorCore, pipelined DMA
_VMEM_LIMIT_BYTES = 32 * 1024 * 1024   # covers 2x in + 2x out at the largest block size


@functools.lru_cache(maxsize=None)
def _target_block_bytes() -> int:
    """Per-block byte budget; bigger on v7x to amortize per-step overhead."""
    target = 4 * 1024 * 1024
    try:
        info = pltpu.get_tpu_info()
        phys_vmem = int(getattr(info, "vmem_capacity_bytes", 0) or 0)
        # v7x has 64 MiB VMEM per TensorCore (v5e/v6e have 128 MiB) and much
        # faster HBM, so larger blocks pay off there.
        if 0 < phys_vmem <= 64 * 1024 * 1024:
            target = 6 * 1024 * 1024
    except Exception:
        pass
    return target


def _alpha_tanh_kernel(alpha_ref, x_ref, o_ref):
    # tanh -> EUP slot, scale -> VPU; neither is the bottleneck (HBM is).
    # NOTE(v7x): jnp.tanh should lower to a single native EUP tanh push; if the
    # Mosaic dump ever shows an exp/recip expansion, switch to lax.tanh.
    t = jnp.tanh(x_ref[...])
    # Apply alpha in f32 (PyTorch scalar op-math), cast once at the end.
    o_ref[...] = (alpha_ref[0] * t.astype(jnp.float32)).astype(o_ref.dtype)


def _choose_tile_rows(rows: int, itemsize: int, target_bytes: int) -> int:
    # Sublane tile is dtype dependent: 8 (f32), 16 (bf16/f16), 32 (int8/fp8).
    sub = max(8, 32 // itemsize)
    if rows <= sub:
        return rows  # single full-extent block (allowed even when unaligned)
    target = max(sub, (target_bytes // (_LANE * itemsize)) // sub * sub)
    # Cap the tile so we get >= _MIN_GRID_STEPS grid steps when rows allow:
    # keeps the DMA pipeline busy and both v7x cores loaded.
    cap = pl.cdiv(rows, _MIN_GRID_STEPS)
    cap = (cap + sub - 1) // sub * sub
    return max(sub, min(target, cap))


def _run_kernel(x2d: jax.Array, alpha_arr: jax.Array) -> jax.Array:
    rows, lanes = x2d.shape
    itemsize = jnp.dtype(x2d.dtype).itemsize
    tile_rows = _choose_tile_rows(rows, itemsize, _target_block_bytes())
    grid = pl.cdiv(rows, tile_rows)
    return pl.pallas_call(
        _alpha_tanh_kernel,
        out_shape=jax.ShapeDtypeStruct((rows, lanes), x2d.dtype),
        grid_spec=pltpu.PrefetchScalarGridSpec(
            num_scalar_prefetch=0,
            grid=(grid,),
            in_specs=[
                pl.BlockSpec(memory_space=pltpu.MemorySpace.SMEM),  # alpha (f32)
                pl.BlockSpec((tile_rows, lanes), lambda i: (i, 0)),
            ],
            out_specs=pl.BlockSpec((tile_rows, lanes), lambda i: (i, 0)),
        ),
        compiler_params=pltpu.CompilerParams(
            dimension_semantics=("parallel",),
            vmem_limit_bytes=_VMEM_LIMIT_BYTES,
        ),
    )(alpha_arr, x2d)


def _scale_tanh_jnp(x, alpha_arr, out_dtype):
    # Tiny epilogue path (< 128 elements); numerics identical to the kernel.
    return (alpha_arr[0] * jnp.tanh(x).astype(jnp.float32)).astype(out_dtype)


@jax.jit
def _alpha_tanh_impl(x: jax.Array, alpha_arr: jax.Array) -> jax.Array:
    orig_shape = x.shape
    orig_dtype = x.dtype
    total = x.size
    if total == 0:
        return x

    if total % _LANE == 0:
        # Fast path: pad-free lane-dense view -> minimum 2N bytes of HBM traffic.
        rows = total // _LANE
        out2d = _run_kernel(x.reshape(rows, _LANE), alpha_arr)
        return out2d.reshape(orig_shape)

    # Ragged size: kernel on the 128-multiple prefix, tiny jnp tail epilogue
    # (no whole-array pad before the kernel, no whole-array slice after it).
    x_flat = x.reshape(-1)
    main_rows = total // _LANE
    if main_rows == 0:
        return _scale_tanh_jnp(x_flat, alpha_arr, orig_dtype).reshape(orig_shape)
    main_n = main_rows * _LANE
    y_main = _run_kernel(x_flat[:main_n].reshape(main_rows, _LANE), alpha_arr)
    y_tail = _scale_tanh_jnp(x_flat[main_n:], alpha_arr, orig_dtype)
    return jnp.concatenate([y_main.reshape(-1), y_tail]).reshape(orig_shape)


def alpha_tanh(x: jax.Array, alpha: float = 2.0) -> jax.Array:
    """Elementwise alpha * tanh(x) (PyTorch alphaTanh forward). Any shape."""
    if not jnp.issubdtype(x.dtype, jnp.floating):
        raise TypeError(f"alpha_tanh expects a floating dtype, got {x.dtype}")
    alpha_arr = jnp.asarray([alpha], dtype=jnp.float32)
    return _alpha_tanh_impl(x, alpha_arr)


if __name__ == "__main__":
    key = jax.random.PRNGKey(0)
    k0, k1, k2, k3 = jax.random.split(key, 4)

    def ref(x, alpha=2.0):
        return (jnp.float32(alpha) * jnp.tanh(x).astype(jnp.float32)).astype(x.dtype)

    # 1) NCHW f32, lane-multiple fast path: batch=2, channels=4, spatial=16x16.
    x = jax.random.normal(k0, (2, 4, 16, 16), dtype=jnp.float32)
    y = jax.block_until_ready(alpha_tanh(x, alpha=2.0))
    assert y.shape == x.shape and y.dtype == x.dtype
    assert jnp.max(jnp.abs(y - ref(x))) < 1e-5

    # 2) bf16 with a partial last grid block (rows=36, tile_rows=16, grid=3).
    xb = jax.random.normal(k1, (3, 1536), dtype=jnp.bfloat16)
    yb = jax.block_until_ready(alpha_tanh(xb, alpha=2.0))
    assert yb.shape == xb.shape and yb.dtype == xb.dtype
    assert jnp.max(jnp.abs(yb.astype(jnp.float32) - ref(xb).astype(jnp.float32))) < 5e-2

    # 3) Ragged f32 size (kernel on 128-multiple prefix + tiny tail epilogue).
    xr = jax.random.normal(k2, (2, 4, 17, 17), dtype=jnp.float32)
    yr = jax.block_until_ready(alpha_tanh(xr, alpha=1.5))
    assert yr.shape == xr.shape and yr.dtype == xr.dtype
    assert jnp.max(jnp.abs(yr - ref(xr, 1.5))) < 1e-5

    # 4) Tiny (<128 element) input, pure-jnp path.
    xt = jax.random.normal(k3, (5, 7), dtype=jnp.float32)
    yt = jax.block_until_ready(alpha_tanh(xt, alpha=2.0))
    assert jnp.max(jnp.abs(yt - ref(xt))) < 1e-5

    print("KERNEL_OK")
</pallas_src>

<mosaic_0001>
module attributes {stable_mosaic.version = 11 : i64} {
  func.func @_alpha_tanh_kernel(%arg0: i32, %arg1: memref<1xf32, #tpu.memory_space<smem>>, %arg2: memref<8x128xf32, #tpu.memory_space<vmem>>, %arg3: memref<8x128xf32, #tpu.memory_space<vmem>>) attributes {dimension_semantics = [#tpu.dimension_semantics<parallel>], iteration_bounds = array<i64: 2>, scalar_prefetch = 0 : i64, scratch_operands = 0 : i64, tpu.core_type = #tpu.core_type<tc>, window_params = [{transform_indices = @transform_0, window_bounds = array<i64: 1>}, {transform_indices = @transform_1, window_bounds = array<i64: 8, 128>}, {transform_indices = @transform_2, window_bounds = array<i64: 8, 128>}]} {
    %c0 = arith.constant 0 : index
    %c0_0 = arith.constant 0 : index
    %0 = vector.load %arg2[%c0, %c0_0] : memref<8x128xf32, #tpu.memory_space<vmem>>, vector<8x128xf32>
    %1 = math.tanh %0 : vector<8x128xf32>
    %c0_1 = arith.constant 0 : index
    %2 = memref.load %arg1[%c0_1] : memref<1xf32, #tpu.memory_space<smem>>
    %3 = vector.broadcast %2 : f32 to vector<8x128xf32>
    %4 = arith.mulf %3, %1 : vector<8x128xf32>
    %c0_2 = arith.constant 0 : index
    %c0_3 = arith.constant 0 : index
    %5 = vector.load %arg3[%c0_2, %c0_3] : memref<8x128xf32, #tpu.memory_space<vmem>>, vector<8x128xf32>
    tpu.vector_store %arg3[%c0_2, %c0_3], %4 {strides = array<i32>} : memref<8x128xf32, #tpu.memory_space<vmem>>, vector<8x128xf32>,
    return
  }
  func.func @transform_0(%arg0: i32) -> i32 {
    %c0_i32 = arith.constant 0 : i32
    %c0_i32_0 = arith.constant 0 : i32
    return %c0_i32 : i32
  }
  func.func @transform_1(%arg0: i32) -> (i32, i32) {
    %c0_i32 = arith.constant 0 : i32
    %c0_i32_0 = arith.constant 0 : i32
    return %arg0, %c0_i32 : i32, i32
  }
  func.func @transform_2(%arg0: i32) -> (i32, i32) {
    %c0_i32 = arith.constant 0 : i32
    %c0_i32_0 = arith.constant 0 : i32
    return %arg0, %c0_i32 : i32, i32
  }
}

</mosaic_0001>

<bundles_post_ra>
// kernel: _alpha_tanh_impl.1
= control target key start
LH: loop header
LB: loop body
LE: loop exit
PB: predicated region body
PF: predicated region fallthrough
CT: control target
= control target key end

     0   :  { %s222_s11 = smov 0   ;;  %s250_s0 = inlined_call_operand.<no memory space> [shape: f32[1], index: 0, kind: input, shape index: {}]   ;;  %s251_s1 = inlined_call_operand.vmem [shape: f32[16,128], index: 1, kind: input, shape index: {}]   ;;  %s252_s2 = inlined_call_operand.vmem [shape: f32[16,128], index: 2, kind: output, shape index: {}]  }
   0x1   :  { %7 = sst [smem:[#allocation2]] %s250_s0 }
   0x2 LB: > { %s199_s12 = sadd.s32 4294967295, %s224_s11   ;;  %p203_p0 = scmp.ge.s32.totalorder %s224_s11, 1  ;;  %s224_s11 = sphi %s222_s11, %s13_s11  }
   0x3   : > { %p112_p1 = scmp.lt.s32.totalorder %s224_s11, 3 }
   0x5   : > { %p113_p2 = pnand %p203_p0, %p112_p1 }
   0x6   : > { %p132_p3 = scmp.lt.s32.totalorder (!%p113_p2), %s199_s12, 1  ;;  %s142_s13 = sld [smem:[#allocation2]] (!%p113_p2) }
   0x7   : > { %116 = sbr.rel (%p113_p2) target bundleno = 26 (0x1a), region = 28 }
   0xc   : > { %s254_s12 = smov (!%p132_p3, %s199_s12), 1  ;;  %v143_v1 = vstv %s142_s13 }
   0xd   : > { %s204_s14 = sshll.u32 %s254_s12, 3 }
   0xe   : > { %s135_s17 = scalar_lea.vmem %s251_s1, %s204_s14  ;;  %s139_s19 = scalar_lea.vmem %s252_s2, %s204_s14 }
   0xf   : > { %v140_v0 = vld [vmem:[%s135_s17] sm:$0xff] }
  0x10   : > { %216 = vtanh.f32 %v140_v0 }
  0x16   : > { %v217_v2 = vpop.eup %216 }
  0x17   : > { %v144_v3 = vmul.f32 %v217_v2, %v143_v1 }
  0x19   : > { %145 = vst [vmem:[%s139_s19] sm:$0xff] %v144_v3 }
  0x1a PF: > { %s13_s11 = sadd.s32 1, %s224_s11  }
  0x1b   : > { %p10_p4 = scmp.ge.s32.totalorder %s13_s11, 4  }
  0x1d   :  { %12 = sbr.rel (!%p10_p4) target bundleno = 2 (0x2), region = 58 }

</bundles_post_ra>
